<compile_context>
chip_gen: v7x
topology: tpu7x:2x2x1
jax: 0.10.0
libtpu: 0.0.40
codegen_flags: <defaults>
</compile_context>

<pallas_src>
import functools

import jax
import jax.numpy as jnp
from jax import lax
from jax.experimental import pallas as pl
from jax.experimental.pallas import tpu as pltpu


def _round_up(v, m):
    return ((v + m - 1) // m) * m


def _dt_exp_kernel(x_ref, ct_ref, side_ref, out_ref, *, eps, n_centers,
                   augmented, mask_cols, exp_dtype):
    x = x_ref[...]                                       # (bn, D) native dtype
    xf = x.astype(jnp.float32)
    x2 = jnp.sum(xf * xf, axis=-1, keepdims=True)        # (bn, 1)  ||x||^2

    if augmented:
        # ct_ref: (D+1, Cp) f32 with rows 0..D-1 = -2*centers^T, row D = ||c||^2.
        # Augmenting x with a ones column lets the MXU produce -2 x.c + ||c||^2
        # directly, removing the broadcast add / *2 mul from the (bn, C) tile.
        ones = jnp.ones((x.shape[0], 1), dtype=jnp.float32)
        x_aug = jnp.concatenate([xf, ones], axis=-1)      # (bn, D+1)
        xc = jnp.dot(x_aug, ct_ref[...], preferred_element_type=jnp.float32)
        d2 = jnp.maximum(x2 + xc, 0.0)                    # (bn, Cp)
        scaler = side_ref[...]                            # (1, Cp)
    else:
        # bf16 path: keep ||c||^2 / scaler in a f32 (2, Cp) side input so the
        # magnitude term never goes through the bf16 MXU.
        xc = jnp.dot(x, ct_ref[...], preferred_element_type=jnp.float32)
        side = side_ref[...]                              # (2, Cp) f32
        c2 = side[0:1, :]
        scaler = side[1:2, :]
        d2 = jnp.maximum(x2 + c2 - 2.0 * xc, 0.0)
    dists = jnp.sqrt(d2)                                  # (bn, Cp)

    if mask_cols:
        cp = dists.shape[-1]
        col = lax.broadcasted_iota(jnp.int32, (1, cp), 1)
        valid = (col < n_centers).astype(jnp.float32)     # (1, Cp)
        d_stat = dists * valid
        d2_stat = d2 * valid
    else:
        d_stat = dists
        d2_stat = d2

    # Single-pass per-row statistics over the (real) centers axis, f32.
    inv_n = 1.0 / n_centers
    row_sum = jnp.sum(d_stat, axis=-1, keepdims=True)     # (bn, 1)
    row_sumsq = jnp.sum(d2_stat, axis=-1, keepdims=True)  # (bn, 1)
    row_mean = row_sum * inv_n
    row_var = jnp.maximum(row_sumsq - n_centers * row_mean * row_mean, 0.0)
    row_var = row_var * (1.0 / (n_centers - 1))           # unbiased (ddof=1)
    inv_std = lax.rsqrt(row_var + eps)                    # (bn, 1)  EUP

    # out = exp((-(d - mean) * inv_std - 2) * scaler)
    #     = exp(((mean * inv_std - 2) - d * inv_std) * scaler)
    shift = row_mean * inv_std - 2.0                      # (bn, 1)
    z = (shift - dists * inv_std) * scaler                # (bn, Cp)
    out_ref[...] = jnp.exp(z.astype(exp_dtype)).astype(out_ref.dtype)


def _pick_block_rows(n_rows, bn_cap, row_align):
    """Largest aligned row tile <= bn_cap targeting >=4, preferably even, steps."""
    if n_rows <= row_align:
        return row_align
    bn = min(bn_cap, _round_up(pl.cdiv(n_rows, 4), row_align))
    bn = max(bn, row_align)
    steps = pl.cdiv(n_rows, bn)
    if steps > 1 and steps % 2:
        bn2 = max(row_align, _round_up(pl.cdiv(n_rows, steps + 1), row_align))
        if pl.cdiv(n_rows, bn2) % 2 == 0:
            bn = bn2
    return bn


def distance_transform_exp(x, centers, scaler, eps=1e-5, block_rows=None,
                           low_precision_exp=None):
    """Forward pass of DistanceTransform_Exp (bias=False). Returns (N, C)."""
    x = jnp.asarray(x)
    centers = jnp.asarray(centers)
    N, D = x.shape
    C, Dc = centers.shape
    assert D == Dc, (D, Dc)
    assert C >= 2, "unbiased variance needs at least 2 centers"

    out_dtype = x.dtype
    isz = jnp.dtype(x.dtype).itemsize
    is_f32 = (x.dtype == jnp.float32)
    if low_precision_exp is None:
        low_precision_exp = (x.dtype == jnp.bfloat16)
    exp_dtype = jnp.bfloat16 if low_precision_exp else jnp.float32

    # Lane-dense output: pad the centers axis to a multiple of 128 and mask the
    # padded columns out of the row statistics inside the kernel.
    C_pad = _round_up(C, 128)
    mask_cols = (C_pad != C)

    centers_f32 = centers.astype(jnp.float32)
    c2 = jnp.sum(centers_f32 * centers_f32, axis=-1)                  # (C,)
    scaler_f32 = jnp.asarray(scaler, jnp.float32).reshape(C)
    if mask_cols:
        pad = C_pad - C
        centers_f32 = jnp.pad(centers_f32, ((0, pad), (0, 0)))
        c2 = jnp.pad(c2, (0, pad))
        scaler_f32 = jnp.pad(scaler_f32, (0, pad))

    augmented = is_f32
    if augmented:
        # (D+1, C_pad): rows 0..D-1 = -2 * centers^T, row D = ||c||^2.
        ct = jnp.concatenate([-2.0 * centers_f32.T, c2[None, :]], axis=0)
        side = scaler_f32[None, :]                                    # (1, C_pad)
    else:
        ct = centers_f32.T.astype(x.dtype)                            # (D, C_pad)
        side = jnp.stack([c2, scaler_f32], axis=0)                    # (2, C_pad)

    # ----- tiling / VMEM budget -----
    row_align = 8 if isz >= 4 else 16
    try:
        vmem_cap = int(pltpu.get_tpu_info().vmem_capacity_bytes)
    except Exception:
        vmem_cap = 64 * 1024 * 1024            # conservative (v7x per-TC size)
    vmem_ceiling = int(vmem_cap * 0.80)        # headroom for compiler scratch

    resident = int(ct.size) * jnp.dtype(ct.dtype).itemsize + int(side.size) * 4
    # Per-row cost: double-buffered x/out tiles + ~4 f32 (bn, C) temporaries
    # (xc, d2, dists, z) that the old estimate ignored.
    per_row = 2 * D * isz + 2 * C_pad * isz + 4 * C_pad * 4
    avail = max(vmem_ceiling // 2 - resident, row_align * per_row)
    bn_cap = min(512, avail // per_row)
    bn_cap = max(row_align, (bn_cap // row_align) * row_align)

    if block_rows is not None:
        bn = int(block_rows)
        assert bn % row_align == 0, (bn, row_align)
    else:
        bn = _pick_block_rows(N, bn_cap, row_align)

    N_pad = _round_up(N, bn)
    x_in = x if N_pad == N else jnp.pad(x, ((0, N_pad - N), (0, 0)))
    grid = (N_pad // bn,)

    est = (2 * bn * D * isz            # x tiles (double buffered)
           + 2 * bn * C_pad * isz      # out tiles (double buffered)
           + resident                  # centers / side inputs (grid-invariant)
           + 4 * bn * C_pad * 4)       # f32 intermediates (xc, d2, dists, z)
    vmem_limit = int(min(vmem_ceiling, max(32 * 1024 * 1024, 2 * est)))

    kernel = functools.partial(
        _dt_exp_kernel, eps=float(eps), n_centers=C, augmented=augmented,
        mask_cols=mask_cols, exp_dtype=exp_dtype)

    out = pl.pallas_call(
        kernel,
        out_shape=jax.ShapeDtypeStruct((N_pad, C_pad), out_dtype),
        grid=grid,
        in_specs=[
            pl.BlockSpec((bn, D), lambda i: (i, 0)),          # x rows
            pl.BlockSpec(ct.shape, lambda i: (0, 0)),         # centers (grid-invariant)
            pl.BlockSpec(side.shape, lambda i: (0, 0)),       # scaler [+ ||c||^2]
        ],
        out_specs=pl.BlockSpec((bn, C_pad), lambda i: (i, 0)),
        compiler_params=pltpu.CompilerParams(
            dimension_semantics=("parallel",),
            vmem_limit_bytes=vmem_limit),
    )(x_in, ct, side)

    if N_pad != N or C_pad != C:
        out = out[:N, :C]
    return out


def _ref_forward(x, centers, scaler, eps=1e-5):
    """Pure-JAX reference of the PyTorch forward (bias=False)."""
    d = jnp.sqrt(jnp.sum((x[:, None, :] - centers[None, :, :]) ** 2, axis=-1))
    d = d - jnp.mean(d, axis=1, keepdims=True)
    d = d / jnp.sqrt(jnp.var(d, axis=1, keepdims=True, ddof=1) + eps)
    return jnp.exp((-d - 2.0) * scaler)


if __name__ == "__main__":
    # Module config: input_dim=32, num_centers=128 (lane-dense C); batch of 256.
    N, D, C = 256, 32, 128

    key = jax.random.PRNGKey(0)
    kx, kc = jax.random.split(key)
    x = jax.random.normal(kx, (N, D), dtype=jnp.float32)
    # centers = torch.randn(num_centers, input_dim) / 3.0
    centers = jax.random.normal(kc, (C, D), dtype=jnp.float32) / 3.0
    # scaler = torch.ones(1, num_centers) * 3 / 3
    scaler = jnp.ones((1, C), dtype=jnp.float32)

    out = distance_transform_exp(x, centers, scaler)
    out = jax.block_until_ready(out)

    ref = _ref_forward(x, centers, scaler)
    assert out.shape == (N, C)
    max_diff = float(jnp.max(jnp.abs(out - ref)))
    assert jnp.allclose(out, ref, rtol=2e-3, atol=1e-3), f"max abs diff {max_diff}"

    print("KERNEL_OK")
</pallas_src>

<mosaic_0001>
module attributes {stable_mosaic.version = 11 : i64} {
  func.func @_dt_exp_kernel(%arg0: i32, %arg1: memref<64x32xf32, #tpu.memory_space<vmem>>, %arg2: memref<33x128xf32, #tpu.memory_space<vmem>>, %arg3: memref<1x128xf32, #tpu.memory_space<vmem>>, %arg4: memref<64x128xf32, #tpu.memory_space<vmem>>) attributes {dimension_semantics = [#tpu.dimension_semantics<parallel>], iteration_bounds = array<i64: 4>, scalar_prefetch = 0 : i64, scratch_operands = 0 : i64, tpu.core_type = #tpu.core_type<tc>, window_params = [{transform_indices = @transform_0, window_bounds = array<i64: 64, 32>}, {pipeline_mode = #tpu.pipeline_mode<synchronous>, transform_indices = @transform_1, window_bounds = array<i64: 33, 128>}, {pipeline_mode = #tpu.pipeline_mode<synchronous>, transform_indices = @transform_2, window_bounds = array<i64: 1, 128>}, {transform_indices = @transform_3, window_bounds = array<i64: 64, 128>}]} {
    %c0 = arith.constant 0 : index
    %c0_0 = arith.constant 0 : index
    %0 = vector.load %arg1[%c0, %c0_0] : memref<64x32xf32, #tpu.memory_space<vmem>>, vector<64x32xf32>
    %1 = arith.mulf %0, %0 : vector<64x32xf32>
    %cst = arith.constant dense<0.000000e+00> : vector<64xf32>
    %2 = vector.multi_reduction <add>, %1, %cst [1] : vector<64x32xf32> to vector<64xf32>
    %3 = vector.shape_cast %2 : vector<64xf32> to vector<64x1xf32>
    %cst_1 = arith.constant 1.000000e+00 : f32
    %4 = vector.broadcast %cst_1 : f32 to vector<64x1xf32>
    %5 = tpu.concatenate %0, %4 in 1 : vector<64x32xf32>, vector<64x1xf32> -> vector<64x33xf32>
    %c0_2 = arith.constant 0 : index
    %c0_3 = arith.constant 0 : index
    %6 = vector.load %arg2[%c0_2, %c0_3] : memref<33x128xf32, #tpu.memory_space<vmem>>, vector<33x128xf32>
    %cst_4 = arith.constant dense<0.000000e+00> : vector<64x128xf32>
    %7 = tpu.matmul %5, %6, %cst_4 {dimension_numbers = #tpu.dot_dimension_numbers<[1], [0], [0], [1], [0, 0, 1, 1], [], []>} : vector<64x33xf32>, vector<33x128xf32>, vector<64x128xf32> -> vector<64x128xf32>
    %8 = vector.broadcast %3 : vector<64x1xf32> to vector<64x128xf32>
    %9 = arith.addf %8, %7 : vector<64x128xf32>
    %cst_5 = arith.constant 0.000000e+00 : f32
    %10 = vector.broadcast %cst_5 : f32 to vector<64x128xf32>
    %11 = arith.maximumf %9, %10 : vector<64x128xf32>
    %c0_6 = arith.constant 0 : index
    %c0_7 = arith.constant 0 : index
    %12 = vector.load %arg3[%c0_6, %c0_7] : memref<1x128xf32, #tpu.memory_space<vmem>>, vector<1x128xf32>
    %13 = math.sqrt %11 : vector<64x128xf32>
    %cst_8 = arith.constant dense<0.000000e+00> : vector<64xf32>
    %14 = vector.multi_reduction <add>, %13, %cst_8 [1] : vector<64x128xf32> to vector<64xf32>
    %15 = vector.shape_cast %14 : vector<64xf32> to vector<64x1xf32>
    %cst_9 = arith.constant dense<0.000000e+00> : vector<64xf32>
    %16 = vector.multi_reduction <add>, %11, %cst_9 [1] : vector<64x128xf32> to vector<64xf32>
    %17 = vector.shape_cast %16 : vector<64xf32> to vector<64x1xf32>
    %cst_10 = arith.constant 7.812500e-03 : f32
    %18 = vector.broadcast %cst_10 : f32 to vector<64x1xf32>
    %19 = arith.mulf %15, %18 : vector<64x1xf32>
    %cst_11 = arith.constant 1.280000e+02 : f32
    %20 = vector.broadcast %cst_11 : f32 to vector<64x1xf32>
    %21 = arith.mulf %20, %19 : vector<64x1xf32>
    %22 = arith.mulf %21, %19 : vector<64x1xf32>
    %23 = arith.subf %17, %22 : vector<64x1xf32>
    %cst_12 = arith.constant 0.000000e+00 : f32
    %24 = vector.broadcast %cst_12 : f32 to vector<64x1xf32>
    %25 = arith.maximumf %23, %24 : vector<64x1xf32>
    %cst_13 = arith.constant 0.00787401571 : f32
    %26 = vector.broadcast %cst_13 : f32 to vector<64x1xf32>
    %27 = arith.mulf %25, %26 : vector<64x1xf32>
    %cst_14 = arith.constant 9.99999974E-6 : f32
    %28 = vector.broadcast %cst_14 : f32 to vector<64x1xf32>
    %29 = arith.addf %27, %28 : vector<64x1xf32>
    %30 = math.rsqrt %29 : vector<64x1xf32>
    %31 = arith.mulf %19, %30 : vector<64x1xf32>
    %cst_15 = arith.constant 2.000000e+00 : f32
    %32 = vector.broadcast %cst_15 : f32 to vector<64x1xf32>
    %33 = arith.subf %31, %32 : vector<64x1xf32>
    %34 = vector.broadcast %30 : vector<64x1xf32> to vector<64x128xf32>
    %35 = arith.mulf %13, %34 : vector<64x128xf32>
    %36 = vector.broadcast %33 : vector<64x1xf32> to vector<64x128xf32>
    %37 = arith.subf %36, %35 : vector<64x128xf32>
    %38 = vector.broadcast %12 : vector<1x128xf32> to vector<64x128xf32>
    %39 = arith.mulf %37, %38 : vector<64x128xf32>
    %40 = math.exp %39 : vector<64x128xf32>
    %c0_16 = arith.constant 0 : index
    %c0_17 = arith.constant 0 : index
    %41 = vector.load %arg4[%c0_16, %c0_17] : memref<64x128xf32, #tpu.memory_space<vmem>>, vector<64x128xf32>
    tpu.vector_store %arg4[%c0_16, %c0_17], %40 {strides = array<i32>} : memref<64x128xf32, #tpu.memory_space<vmem>>, vector<64x128xf32>,
    return
  }
  func.func @transform_0(%arg0: i32) -> (i32, i32) {
    %c0_i32 = arith.constant 0 : i32
    %c0_i32_0 = arith.constant 0 : i32
    return %arg0, %c0_i32 : i32, i32
  }
  func.func @transform_1(%arg0: i32) -> (i32, i32) {
    %c0_i32 = arith.constant 0 : i32
    %c0_i32_0 = arith.constant 0 : i32
    %c0_i32_1 = arith.constant 0 : i32
    return %c0_i32, %c0_i32_0 : i32, i32
  }
  func.func @transform_2(%arg0: i32) -> (i32, i32) {
    %c0_i32 = arith.constant 0 : i32
    %c0_i32_0 = arith.constant 0 : i32
    %c0_i32_1 = arith.constant 0 : i32
    return %c0_i32, %c0_i32_0 : i32, i32
  }
  func.func @transform_3(%arg0: i32) -> (i32, i32) {
    %c0_i32 = arith.constant 0 : i32
    %c0_i32_0 = arith.constant 0 : i32
    return %arg0, %c0_i32 : i32, i32
  }
}

</mosaic_0001>

<bundles_post_ra>
// kernel: tpu_custom_call.1
= control target key start
LH: loop header
LB: loop body
LE: loop exit
PB: predicated region body
PF: predicated region fallthrough
CT: control target
= control target key end

     0   :  { %8 = vsyncpa [#allocation3], 0  ;;  %s1210_s0 = inlined_call_operand.vmem [shape: f32[256,32], index: 0, kind: input, shape index: {}]   ;;  %s1211_s1 = inlined_call_operand.vmem [shape: f32[33,128], index: 1, kind: input, shape index: {}]   ;;  %s1212_s2 = inlined_call_operand.vmem [shape: f32[1,128], index: 2, kind: input, shape index: {}]   ;;  %s1213_s3 = inlined_call_operand.hbm [shape: f32[256,128], index: 3, kind: output, shape index: {}]  }
   0x1   :  { %10 = vsyncpa [#allocation3 + $0x1], 0  ;;  %s931_s12 = smov 0   ;;  %s933_s13 = smov 0  }
   0x2   :  { %s935_s14 = smov 0   ;;  %s937_s15 = smov 0  }
   0x3 LB: > { %s952_s16 = sadd.s32 4294967295, %s906_s15   ;;  %s675_s17 = sadd.s32 4294967294, %s906_s15   ;;  %s906_s15 = sphi %s937_s15, %s1219_s15   ;;  %s902_s14 = sphi %s935_s14, %s1218_s14   ;;  %s898_s13 = sphi %s933_s13, %s1217_s13   ;;  %s894_s12 = sphi %s931_s12, %s1216_s12  }
   0x4   : > { %s956_s18 = sadd.s32 1, %s906_s15   ;;  %s91_s19 = sadd.s32 1, %s902_s14 }
   0x5   : > { %s88_s20 = ssub.s32 %s906_s15, %s956_s18  ;;  %p101_p0 = scmp.ne.s32.totalorder %s902_s14, %s898_s13 }
   0x6   : > { %p89_p1 = scmp.eq.s32.totalorder %s88_s20, 0  ;;  %p102_p2 = scmp.eq.s32.totalorder %s952_s16, 3 }
   0x7   : > { %p107_p3 = scmp.ne.s32.totalorder %s898_s13, %s894_s12  ;;  %p108_p4 = scmp.eq.s32.totalorder %s675_s17, 3 }
   0x8   : > { %s967_s21 = scalar_select %p89_p1, %s902_s14, %s91_s19  }
   0x9   : > { %p969_p5 = por %p102_p2, %p101_p0  ;;  %p973_p6 = por %p108_p4, %p107_p3 }
   0xa   : > { %p678_p7 = scmp.ge.s32.totalorder %s906_s15, 1  ;;  %p141_p8 = scmp.lt.s32.totalorder %s906_s15, 5 }
   0xc   : > { %p142_p9 = pnand %p678_p7, %p141_p8 }
   0xd   : > { %v221_v0 = vld [vmem:[%s1211_s1] sm:$0xff] (!%p142_p9)  ;;  %v222_v1 = vld [vmem:[%s1211_s1 + $0x8] sm:$0xff] (!%p142_p9)  ;;  %v223_v2 = vld [vmem:[%s1211_s1 + $0x10] sm:$0xff] (!%p142_p9)  ;;  %s680_s30 = sshll.u32 (!%p142_p9), %s952_s16, 3  ;;  %vm188_vm0 = vcmask (!%p142_p9), 261120   ;;  %vm251_vm1 = vcmask (!%p142_p9), 1040384  }
   0xe   : > { %145 = sbr.rel (%p142_p9) target bundleno = 476 (0x1dc), region = 32  ;;  %v741_v3 = vpack.c.bf16 (!%p142_p9), %v222_v1, %v221_v0  ;;  %v224_v4 = vld [vmem:[%s1211_s1 + $0x18] sm:$0xff] (!%p142_p9)  ;;  %p166_p10 = scmp.lt.s32.totalorder (!%p142_p9), %s680_s30, 31  ;;  %v225_v6 = vld [vmem:[%s1211_s1 + $0x20] sm:$0x1] (!%p142_p9)  ;;  %vm226_vm2 = vcmask (!%p142_p9), 269312  }
   0xf   : > { %v745_v5 = vpack.c.bf16 (!%p142_p9), %v224_v4, %v223_v2  ;;  %s162_s20 = sand.u32 (!%p142_p9), 1, %s898_s13   ;;  %s705_s26 = sshll.u32 (!%p142_p9), %s952_s16, 10 }
  0x10   : > { %742 = vmatprep.subr.bf16.mxu0 (!%p142_p9), %v741_v3  ;;  %749 = vmatprep.subr.bf16.mxu1 (!%p142_p9), %v741_v3  ;;  %s679_s24 = sshll.u32 (!%p142_p9), %s162_s20, 6  ;;  %s1169_s4 = scalar_lea.sflag (!%p142_p9), [#allocation3], %s162_s20 }
  0x11   : > { %744 = vmatpush3.bf16.msra.mxu0 (!%p142_p9), %v741_v3  ;;  %752 = vmatpush3.bf16.msra.mxu1 (!%p142_p9), %v741_v3  ;;  %s164_s25 = scalar_lea.vmem (!%p142_p9), [#allocation2], %s679_s24  ;;  %s908_s5 = smov (!%p142_p9), [#allocation2]  }
  0x12   : > { %746 = vmatprep.subr.bf16.mxu0 (!%p142_p9), %v745_v5  ;;  %750 = vmatprep.subr.bf16.mxu1 (!%p142_p9), %v745_v5  ;;  %s613_s27 = sshll.u32 (!%p142_p9), %s164_s25, 4  ;;  %s1165_s27 = int_to_ptr.vmem [resolvable:$true] %s613_s27 }
  0x13   : > { %s844_s16 = scalar_lea.vmem (!%p142_p9), %s1165_s27, 1024 }
  0x14   : > { %p845_p11 = scmp.ne.s32.totalorder (!%p142_p9), %s1165_s27, %s844_s16 }
  0x15   : > { %s1221_s30 = smov (!%p166_p10, %s680_s30), 31  ;;  %748 = vmatpush3.bf16.msra.mxu0 %v745_v5  ;;  %753 = vmatpush3.bf16.msra.mxu1 %v745_v5 }
  0x16   : > { %s681_s6 = sshll.u32 %s1221_s30, 3  ;;  %727 = vmatprep.subr.msk.mxu0 %vm251_vm1, %v225_v6  ;;  %751 = vmatprep.subr.msk.mxu1 %vm251_vm1, %v225_v6  ;;  %s1163_s30 = scalar_lea.hbm %s1213_s3, %s705_s26 }
  0x17   : > { %s169_s11 = scalar_lea.vmem %s1210_s0, %s681_s6  ;;  %p846_p12 = pnand %p845_p11, %p969_p5 }
  0x18   : > { %v172_v7 = vld [vmem:[%s169_s11] sm:$0xff]  ;;  %v173_v9 = vld [vmem:[%s169_s11 + $0x8] sm:$0xff]  ;;  %v174_v13 = vld [vmem:[%s169_s11 + $0x10] sm:$0xff]  ;;  %s848_s6 = sshll.u32 %s908_s5, 4  ;;  %s849_s6 = int_to_ptr.vmem [resolvable:$false] %s848_s6 }
  0x19   : > { %v176_v8 = vld [vmem:[%s169_s11 + $0x20] sm:$0xff]  ;;  %v213_v10 = vsel %vm188_vm0, %v172_v7, 1.0  ;;  %v177_v12 = vld [vmem:[%s169_s11 + $0x28] sm:$0xff]  ;;  %v178_v14 = vld [vmem:[%s169_s11 + $0x30] sm:$0xff]  ;;  %v180_v15 = vmul.f32 %v172_v7, %v172_v7  ;;  %v182_v16 = vmul.f32 %v174_v13, %v174_v13  ;;  %v214_v17 = vsel %vm188_vm0, %v173_v9, 1.0  ;;  %728 = vmatpush3.msk.msra.mxu0 %vm251_vm1, %v225_v6  ;;  %754 = vmatpush3.msk.msra.mxu1 %vm251_vm1, %v225_v6  ;;  %p847_p13 = pneg %p846_p12  ;;  %s850_s7 = scalar_lea.vmem %s849_s6, 2048 }
  0x1a   : > { %v217_v11 = vsel %vm188_vm0, %v176_v8, 1.0  ;;  %729 = vmatprep.mubr.msk.f32.mxu0 %vm226_vm2, %v213_v10  ;;  %v218_v18 = vsel %vm188_vm0, %v177_v12, 1.0  ;;  %v215_v20 = vsel %vm188_vm0, %v174_v13, 1.0  ;;  %v219_v21 = vsel %vm188_vm0, %v178_v14, 1.0  ;;  %v175_v22 = vld [vmem:[%s169_s11 + $0x18] sm:$0xff]  ;;  %p851_p0 = scmp.lt.s32.totalorder %s1165_s27, %s849_s6  ;;  %p852_p1 = scmp.lt.s32.totalorder %s850_s7, %s844_s16 }
  0x1b   : > { %735 = vmatprep.mubr.msk.f32.mxu1 %vm226_vm2, %v217_v11  ;;  %v189_v19 = vsel %vm188_vm0, %v180_v15, 0.0  ;;  %v179_v23 = vld [vmem:[%s169_s11 + $0x38] sm:$0xff]  ;;  %v181_v24 = vmul.f32 %v173_v9, %v173_v9  ;;  %v195_v25 = vsel %vm188_vm0, %v182_v16, 0.0  ;;  %v183_v26 = vmul.f32 %v175_v22, %v175_v22  ;;  %730 = vmatmul.mubr.msk.f32.vlgmr.msra.gmra.mrb[0].mxu0 %vm226_vm2, %v214_v17 }
  0x1c   : > { %190 = vadd.xlane.f32.xlu0 %v189_v19  ;;  %v184_v27 = vmul.f32 %v176_v8, %v176_v8  ;;  %736 = vmatmul.mubr.msk.f32.vlgmr.msra.gmra.mrb[0].mxu1 %vm226_vm2, %v218_v18  ;;  %v216_v29 = vsel %vm188_vm0, %v175_v22, 1.0  ;;  %v220_v30 = vsel %vm188_vm0, %v179_v23, 1.0  ;;  %v185_v32 = vmul.f32 %v177_v12, %v177_v12  ;;  %p853_p2 = por %p852_p1, %p851_p0 }
  0x1d   : > { %v192_v28 = vsel %vm188_vm0, %v181_v24, 0.0  ;;  %732 = vmatprep.mubr.msk.f32.mxu0 %vm226_vm2, %v215_v20  ;;  %738 = vmatprep.mubr.msk.f32.mxu1 %vm226_vm2, %v219_v21  ;;  %v198_v31 = vsel %vm188_vm0, %v183_v26, 0.0  ;;  %v186_v34 = vmul.f32 %v178_v14, %v178_v14  ;;  %v187_v36 = vmul.f32 %v179_v23, %v179_v23 }
  0x1e   : > { %196 = vadd.xlane.f32.xlu1 %v195_v25  ;;  %v201_v33 = vsel %vm188_vm0, %v184_v27, 0.0  ;;  %v204_v35 = vsel %vm188_vm0, %v185_v32, 0.0  ;;  %p854_p3 = pnand %p853_p2, %p847_p13 }
  0x1f   : > { %733 = vmatmul.mubr.msk.f32.gmra.mrb[2].mxu0 %vm226_vm2, %v216_v29  ;;  %v207_v37 = vsel %vm188_vm0, %v186_v34, 0.0  ;;  %v210_v38 = vsel %vm188_vm0, %v187_v36, 0.0 }
  0x20   : > { %193 = vadd.xlane.f32.xlu0 %v192_v28  ;;  %739 = vmatmul.mubr.msk.f32.gmra.mrb[2].mxu1 %vm226_vm2, %v220_v30 }
  0x22   : > { %199 = vadd.xlane.f32.xlu1 %v198_v31 }
  0x24   : > { %202 = vadd.xlane.f32.xlu0 %v201_v33 }
  0x26   : > { %205 = vadd.xlane.f32.xlu1 %v204_v35 }
  0x28   : > { %208 = vadd.xlane.f32.xlu0 %v207_v37 }
  0x2a   : > { %211 = vadd.xlane.f32.xlu1 %v210_v38 }
  0xa9   : > { %v191_v40 = vpop.xlane.xlu0 %190 }
  0xab   : > { %v197_v39 = vpop.xlane.xlu1 %196 }
  0xad   : > { %v194_v42 = vpop.xlane.xlu0 %193 }
  0xaf   : > { %v200_v41 = vpop.xlane.xlu1 %199 }
  0xb1   : > { %v203_v44 = vpop.xlane.xlu0 %202 }
  0xb3   : > { %v206_v43 = vpop.xlane.xlu1 %205 }
  0xb5   : > { %v209_v55 = vpop.xlane.xlu0 %208 }
  0xb7   : > { %v212_v53 = vpop.xlane.xlu1 %211 }
  0xee   : > { %v731_v46 = vpop.f32.mrb[0].mxu0 }
  0xef   : > { %v737_v45 = vpop.f32.mrb[0].mxu1  ;;  %v361_v48 = vadd.f32 %v731_v46, %v194_v42  ;;  %v321_v49 = vpop.f32.mrb[1].mxu0 }
  0xf0   : > { %v365_v47 = vadd.f32 %v737_v45, %v206_v43  ;;  %v341_v50 = vpop.f32.mrb[1].mxu1  ;;  %v360_v51 = vadd.f32 %v321_v49, %v191_v40 }
  0xf1   : > { %v364_v52 = vadd.f32 %v341_v50, %v203_v44  ;;  %v369_v54 = vmax.f32 %v361_v48, 0.0 }
  0xf2   : > { %v368_v56 = vmax.f32 %v360_v51, 0.0  ;;  %v734_v58 = vpop.f32.mrb[2].mxu0  ;;  %v1026_v59 = vmax.f32 %v365_v47, 0.0 }
  0xf3   : > { %v740_v57 = vpop.f32.mrb[2].mxu1  ;;  %v363_v61 = vadd.f32 %v734_v58, %v200_v41  ;;  %v331_v62 = vpop.f32.mrb[3].mxu0  ;;  %451 = vadd.xlane.f32.xlu1 %v369_v54  ;;  %796 = vrsqrt.f32 %v369_v54  ;;  %v1028_v0 = vmax.f32 %v364_v52, 0.0  ;;  %vm386_vm3 = vcmp.eq.f32.partialorder %v369_v54, inf }
  0xf4   : > { %v367_v60 = vadd.f32 %v740_v57, %v212_v53  ;;  %v351_v63 = vpop.f32.mrb[3].mxu1  ;;  %v362_v1 = vadd.f32 %v331_v62, %v197_v39  ;;  %449 = vadd.xlane.f32.xlu0 %v368_v56  ;;  %798 = vrsqrt.f32 %v368_v56  ;;  %v389_v10 = vand.u32 2147483648, %v369_v54 }
  0xf5   : > { %v366_v2 = vadd.f32 %v351_v63, %v209_v55  ;;  %v371_v3 = vmax.f32 %v363_v61, 0.0  ;;  %800 = vrsqrt.f32 %v1026_v59  ;;  %vm388_vm4 = vcmp.eq.f32.partialorder %v369_v54, 0.0 }
  0xf6   : > { %v1030_v4 = vmax.f32 %v362_v1, 0.0  ;;  %v1032_v5 = vmax.f32 %v367_v60, 0.0  ;;  %802 = vrsqrt.f32 %v1028_v0  ;;  %vm379_vm5 = vcmp.eq.f32.partialorder %v368_v56, inf }
  0xf7   : > { %455 = vadd.xlane.f32.xlu1 %v371_v3  ;;  %v1035_v6 = vmax.f32 %v366_v2, 0.0  ;;  %804 = vrsqrt.f32 %v371_v3  ;;  %v382_v15 = vand.u32 2147483648, %v368_v56  ;;  %vm381_vm6 = vcmp.eq.f32.partialorder %v368_v56, 0.0 }
  0xf8   : > { %453 = vadd.xlane.f32.xlu0 %v1030_v4  ;;  %806 = vrsqrt.f32 %v1030_v4  ;;  %vm414_vm7 = vcmp.eq.f32.partialorder %v1026_v59, inf  ;;  %vm416_vm8 = vcmp.eq.f32.partialorder %v1026_v59, 0.0  ;;  %v417_v21 = vand.u32 2147483648, %v1026_v59 }
  0xf9   : > { %808 = vrsqrt.f32 %v1032_v5  ;;  %vm407_vm9 = vcmp.eq.f32.partialorder %v1028_v0, inf  ;;  %v410_v25 = vand.u32 2147483648, %v1028_v0  ;;  %vm400_vm10 = vcmp.eq.f32.partialorder %v371_v3, inf }
  0xfa   : > { %810 = vrsqrt.f32 %v1035_v6  ;;  %vm409_vm11 = vcmp.eq.f32.partialorder %v1028_v0, 0.0  ;;  %v403_v35 = vand.u32 2147483648, %v371_v3  ;;  %vm393_vm12 = vcmp.eq.f32.partialorder %v1030_v4, inf }
  0xfb   : > { %vm402_vm13 = vcmp.eq.f32.partialorder %v371_v3, 0.0  ;;  %v396_v39 = vand.u32 2147483648, %v1030_v4  ;;  %vm428_vm14 = vcmp.eq.f32.partialorder %v1032_v5, inf  ;;  %vm395_vm15 = vcmp.eq.f32.partialorder %v1030_v4, 0.0 }
  0xfc   : > { %v431_v42 = vand.u32 2147483648, %v1032_v5  ;;  %vm421_vm0 = vcmp.eq.f32.partialorder %v1035_v6, inf  ;;  %vm430_vm1 = vcmp.eq.f32.partialorder %v1032_v5, 0.0  ;;  %v424_v45 = vand.u32 2147483648, %v1035_v6 }
  0xfd   : > { %v797_v7 = vpop.eup %796  ;;  %vm423_vm2 = vcmp.eq.f32.partialorder %v1035_v6, 0.0 }
  0xfe   : > { %v385_v8 = vmul.f32 %v797_v7, %v369_v54  ;;  %v799_v9 = vpop.eup %798 }
  0xff   : > { %v378_v12 = vmul.f32 %v799_v9, %v368_v56  ;;  %v801_v13 = vpop.eup %800 }
 0x100   : > { %v387_v11 = vsel %vm386_vm3, %v369_v54, %v385_v8  ;;  %v803_v16 = vpop.eup %802  ;;  %v413_v18 = vmul.f32 %v801_v13, %v1026_v59 }
 0x101   : > { %v1042_v14 = vsel %vm388_vm4, %v389_v10, %v387_v11  ;;  %v380_v17 = vsel %vm379_vm5, %v368_v56, %v378_v12  ;;  %v805_v19 = vpop.eup %804  ;;  %v406_v22 = vmul.f32 %v803_v16, %v1028_v0 }
 0x102   : > { %435 = vadd.xlane.f32.xlu1 %v1042_v14  ;;  %v1047_v20 = vsel %vm381_vm6, %v382_v15, %v380_v17  ;;  %v807_v23 = vpop.eup %806  ;;  %v415_v24 = vsel %vm414_vm7, %v1026_v59, %v413_v18  ;;  %v399_v26 = vmul.f32 %v805_v19, %v371_v3 }
 0x103   : > { %433 = vadd.xlane.f32.xlu0 %v1047_v20  ;;  %v809_v27 = vpop.eup %808  ;;  %v1056_v28 = vsel %vm416_vm8, %v417_v21, %v415_v24  ;;  %v408_v29 = vsel %vm407_vm9, %v1028_v0, %v406_v22  ;;  %v392_v30 = vmul.f32 %v807_v23, %v1030_v4 }
 0x104   : > { %v811_v31 = vpop.eup %810  ;;  %v401_v32 = vsel %vm400_vm10, %v371_v3, %v399_v26  ;;  %v427_v33 = vmul.f32 %v809_v27, %v1032_v5  ;;  %v1063_v34 = vsel %vm409_vm11, %v410_v25, %v408_v29 }
 0x105   : > { %v394_v36 = vsel %vm393_vm12, %v1030_v4, %v392_v30  ;;  %v420_v37 = vmul.f32 %v811_v31, %v1035_v6  ;;  %v1069_v38 = vsel %vm402_vm13, %v403_v35, %v401_v32 }
 0x106   : > { %443 = vadd.xlane.f32.xlu1 %v1056_v28  ;;  %v429_v40 = vsel %vm428_vm14, %v1032_v5, %v427_v33  ;;  %v1076_v41 = vsel %vm395_vm15, %v396_v39, %v394_v36 }
 0x107   : > { %441 = vadd.xlane.f32.xlu0 %v1063_v34  ;;  %v422_v43 = vsel %vm421_vm0, %v1035_v6, %v420_v37  ;;  %v1083_v44 = vsel %vm430_vm1, %v431_v42, %v429_v40 }
 0x108   : > { %v1088_v46 = vsel %vm423_vm2, %v424_v45, %v422_v43 }
 0x10a   : > { %439 = vadd.xlane.f32.xlu1 %v1069_v38 }
 0x10b   : > { %437 = vadd.xlane.f32.xlu0 %v1076_v41 }
 0x10e   : > { %447 = vadd.xlane.f32.xlu1 %v1083_v44 }
 0x10f   : > { %445 = vadd.xlane.f32.xlu0 %v1088_v46 }
 0x112   : > { %459 = vadd.xlane.f32.xlu1 %v1026_v59 }
 0x113   : > { %457 = vadd.xlane.f32.xlu0 %v1028_v0 }
 0x116   : > { %463 = vadd.xlane.f32.xlu1 %v1032_v5 }
 0x117   : > { %461 = vadd.xlane.f32.xlu0 %v1035_v6 }
 0x180   : > { %v452_v47 = vpop.xlane.xlu1 %451 }
 0x181   : > { %v450_v48 = vpop.xlane.xlu0 %449 }
 0x184   : > { %v456_v49 = vpop.xlane.xlu1 %455 }
 0x185   : > { %v454_v50 = vpop.xlane.xlu0 %453 }
 0x18f   : > { %v436_v51 = vpop.xlane.xlu1 %435 }
 0x190   : > { %v1095_v52 = vmul.f32 0.0078125, %v436_v51  ;;  %v434_v53 = vpop.xlane.xlu0 %433 }
 0x191   : > { %v1098_v55 = vmul.f32 0.0078125, %v434_v53 }
 0x192   : > { %v474_v54 = vmul.f32 128.0, %v1095_v52 }
 0x193   : > { %v444_v56 = vpop.xlane.xlu1 %443  ;;  %v473_v58 = vmul.f32 128.0, %v1098_v55 }
 0x194   : > { %v482_v57 = vmul.f32 %v474_v54, %v1095_v52  ;;  %v1102_v59 = vmul.f32 0.0078125, %v444_v56  ;;  %v442_v60 = vpop.xlane.xlu0 %441 }
 0x195   : > { %v481_v62 = vmul.f32 %v473_v58, %v1098_v55  ;;  %v1105_v63 = vmul.f32 0.0078125, %v442_v60 }
 0x196   : > { %v490_v61 = vsub.f32 %v452_v47, %v482_v57  ;;  %v478_v5 = vmul.f32 128.0, %v1102_v59 }
 0x197   : > { %v440_v0 = vpop.xlane.xlu1 %439  ;;  %v489_v2 = vsub.f32 %v450_v48, %v481_v62  ;;  %v477_v11 = vmul.f32 128.0, %v1105_v63 }
 0x198   : > { %v498_v1 = vmax.f32 %v490_v61, 0.0  ;;  %v1107_v3 = vmul.f32 0.0078125, %v440_v0  ;;  %v438_v4 = vpop.xlane.xlu0 %437  ;;  %v486_v19 = vmul.f32 %v478_v5, %v1102_v59 }
 0x199   : > { %v497_v7 = vmax.f32 %v489_v2, 0.0  ;;  %v1111_v9 = vmul.f32 0.0078125, %v438_v4  ;;  %v485_v26 = vmul.f32 %v477_v11, %v1105_v63 }
 0x19a   : > { %v506_v6 = vmul.f32 0.007874016, %v498_v1  ;;  %v476_v8 = vmul.f32 128.0, %v1107_v3 }
 0x19b   : > { %v448_v10 = vpop.xlane.xlu1 %447  ;;  %v505_v13 = vmul.f32 0.007874016, %v497_v7  ;;  %v475_v16 = vmul.f32 128.0, %v1111_v9 }
 0x19c   : > { %v514_v12 = vadd.f32 1e-05, %v506_v6  ;;  %v484_v15 = vmul.f32 %v476_v8, %v1107_v3  ;;  %v1116_v17 = vmul.f32 0.0078125, %v448_v10  ;;  %v446_v18 = vpop.xlane.xlu0 %445  ;;  %v1133_v8 = vld [vmem:[%s1212_s2] ss:$0 sm:$0xff] }
 0x19d   : > { %v513_v21 = vadd.f32 1e-05, %v505_v13  ;;  %v483_v23 = vmul.f32 %v475_v16, %v1111_v9  ;;  %v1120_v24 = vmul.f32 0.0078125, %v446_v18 }
 0x19e   : > { %812 = vrsqrt.f32 %v514_v12  ;;  %v492_v22 = vsub.f32 %v456_v49, %v484_v15  ;;  %v480_v27 = vmul.f32 128.0, %v1116_v17 }
 0x19f   : > { %v460_v25 = vpop.xlane.xlu1 %459  ;;  %814 = vrsqrt.f32 %v513_v21  ;;  %v491_v30 = vsub.f32 %v454_v50, %v483_v23  ;;  %v479_v35 = vmul.f32 128.0, %v1120_v24 }
 0x1a0   : > { %v500_v29 = vmax.f32 %v492_v22, 0.0  ;;  %v494_v31 = vsub.f32 %v460_v25, %v486_v19  ;;  %v458_v32 = vpop.xlane.xlu0 %457  ;;  %v488_v33 = vmul.f32 %v480_v27, %v1116_v17 }
 0x1a1   : > { %v499_v37 = vmax.f32 %v491_v30, 0.0  ;;  %v493_v40 = vsub.f32 %v458_v32, %v485_v26  ;;  %v487_v51 = vmul.f32 %v479_v35, %v1120_v24 }
 0x1a2   : > { %v508_v36 = vmul.f32 0.007874016, %v500_v29  ;;  %v502_v39 = vmax.f32 %v494_v31, 0.0 }
 0x1a3   : > { %v464_v42 = vpop.xlane.xlu1 %463  ;;  %v507_v45 = vmul.f32 0.007874016, %v499_v37  ;;  %v501_v49 = vmax.f32 %v493_v40, 0.0 }
 0x1a4   : > { %v516_v43 = vadd.f32 1e-05, %v508_v36  ;;  %v510_v47 = vmul.f32 0.007874016, %v502_v39  ;;  %v496_v48 = vsub.f32 %v464_v42, %v488_v33  ;;  %v462_v53 = vpop.xlane.xlu0 %461 }
 0x1a5   : > { %v515_v50 = vadd.f32 1e-05, %v507_v45  ;;  %v509_v57 = vmul.f32 0.007874016, %v501_v49  ;;  %v495_v58 = vsub.f32 %v462_v53, %v487_v51 }
 0x1a6   : > { %816 = vrsqrt.f32 %v516_v43  ;;  %v518_v54 = vadd.f32 1e-05, %v510_v47  ;;  %v504_v56 = vmax.f32 %v496_v48, 0.0 }
 0x1a7   : > { %818 = vrsqrt.f32 %v515_v50  ;;  %v517_v0 = vadd.f32 1e-05, %v509_v57  ;;  %v503_v4 = vmax.f32 %v495_v58, 0.0 }
 0x1a8   : > { %v813_v60 = vpop.eup %812  ;;  %v512_v61 = vmul.f32 0.007874016, %v504_v56  ;;  %820 = vrsqrt.f32 %v518_v54 }
 0x1a9   : > { %v530_v62 = vmul.f32 %v813_v60, %v1095_v52  ;;  %v815_v1 = vpop.eup %814  ;;  %v546_v6 = vmul.f32 %v813_v60, %v1042_v14  ;;  %822 = vrsqrt.f32 %v517_v0  ;;  %v511_v10 = vmul.f32 0.007874016, %v503_v4 }
 0x1aa   : > { %v520_v2 = vadd.f32 1e-05, %v512_v61  ;;  %v529_v7 = vmul.f32 %v815_v1, %v1098_v55  ;;  %v545_v12 = vmul.f32 %v815_v1, %v1047_v20 }
 0x1ab   : > { %v692_v5 = vadd.f32 -2.0, %v530_v62  ;;  %v519_v13 = vadd.f32 1e-05, %v511_v10 }
 0x1ac   : > { %824 = vrsqrt.f32 %v520_v2  ;;  %v691_v52 = vadd.f32 -2.0, %v529_v7 }
 0x1ad   : > { %v554_v11 = vsub.f32 %v692_v5, %v546_v6  ;;  %826 = vrsqrt.f32 %v519_v13 }
 0x1ae   : > { %v553_v16 = vsub.f32 %v691_v52, %v545_v12 }
 0x1af   : > { %v568_v15 = vmul.f32 %v1133_v8, %v554_v11 }
 0x1b0   : > { %v817_v14 = vpop.eup %816  ;;  %v567_v18 = vmul.f32 %v1133_v8, %v553_v16 }
 0x1b1   : > { %v577_v55 = vmul.f32 1.442695, %v568_v15  ;;  %v532_v19 = vmul.f32 %v817_v14, %v1107_v3  ;;  %v819_v21 = vpop.eup %818  ;;  %v548_v22 = vmul.f32 %v817_v14, %v1069_v38 }
 0x1b2   : > { %v821_v23 = vpop.eup %820  ;;  %v575_v25 = vmul.f32 1.442695, %v567_v18  ;;  %v531_v20 = vmul.f32 %v819_v21, %v1111_v9  ;;  %v547_v32 = vmul.f32 %v819_v21, %v1076_v41 }
 0x1b3   : > { %828 = vpow2.f32 %v577_v55  ;;  %v694_v26 = vadd.f32 -2.0, %v532_v19  ;;  %v534_v27 = vmul.f32 %v821_v23, %v1102_v59  ;;  %v823_v29 = vpop.eup %822  ;;  %v550_v38 = vmul.f32 %v821_v23, %v1056_v28 }
 0x1b4   : > { %830 = vpow2.f32 %v575_v25  ;;  %v693_v31 = vadd.f32 -2.0, %v531_v20  ;;  %v533_v35 = vmul.f32 %v823_v29, %v1105_v63  ;;  %v549_v40 = vmul.f32 %v823_v29, %v1063_v34 }
 0x1b5   : > { %v556_v30 = vsub.f32 %v694_v26, %v548_v22  ;;  %v696_v33 = vadd.f32 -2.0, %v534_v27 }
 0x1b6   : > { %v825_v3 = vpop.eup %824  ;;  %v555_v37 = vsub.f32 %v693_v31, %v547_v32  ;;  %v695_v39 = vadd.f32 -2.0, %v533_v35 }
 0x1b7   : > { %v570_v36 = vmul.f32 %v1133_v8, %v556_v30  ;;  %v536_v9 = vmul.f32 %v825_v3, %v1116_v17  ;;  %v558_v59 = vsub.f32 %v696_v33, %v550_v38  ;;  %v552_v45 = vmul.f32 %v825_v3, %v1083_v44  ;;  %v827_v28 = vpop.eup %826 }
 0x1b8   : > { %v569_v41 = vmul.f32 %v1133_v8, %v555_v37  ;;  %v557_v47 = vsub.f32 %v695_v39, %v549_v40  ;;  %v535_v17 = vmul.f32 %v827_v28, %v1120_v24  ;;  %v551_v56 = vmul.f32 %v827_v28, %v1088_v46 }
 0x1b9   : > { %v581_v42 = vmul.f32 1.442695, %v570_v36  ;;  %v698_v43 = vadd.f32 -2.0, %v536_v9  ;;  %v572_v63 = vmul.f32 %v1133_v8, %v558_v59 }
 0x1ba   : > { %v579_v48 = vmul.f32 1.442695, %v569_v41  ;;  %v571_v53 = vmul.f32 %v1133_v8, %v557_v47  ;;  %v697_v54 = vadd.f32 -2.0, %v535_v17 }
 0x1bb   : > { %832 = vpow2.f32 %v581_v42  ;;  %v560_v49 = vsub.f32 %v698_v43, %v552_v45  ;;  %v585_v51 = vmul.f32 1.442695, %v572_v63 }
 0x1bc   : > { %834 = vpow2.f32 %v579_v48  ;;  %v583_v44 = vmul.f32 1.442695, %v571_v53  ;;  %v559_v60 = vsub.f32 %v697_v54, %v551_v56 }
 0x1bd   : > { %v829_v50 = vpop.eup %828  ;;  %v574_v34 = vmul.f32 %v1133_v8, %v560_v49  ;;  %836 = vpow2.f32 %v585_v51 }
 0x1be   : > { %592 = vst [vmem:[%s164_s25 + $0x8] sm:$0xff] %v829_v50  ;;  %v831_v57 = vpop.eup %830  ;;  %838 = vpow2.f32 %v583_v44  ;;  %v573_v24 = vmul.f32 %v1133_v8, %v559_v60 }
 0x1bf   : > { %v589_v58 = vmul.f32 1.442695, %v574_v34  ;;  %591 = vst [vmem:[%s164_s25] sm:$0xff] %v831_v57 }
 0x1c0   : > { %v587_v61 = vmul.f32 1.442695, %v573_v24 }
 0x1c1   : > { %840 = vpow2.f32 %v589_v58 }
 0x1c2   : > { %842 = vpow2.f32 %v587_v61 }
 0x1c5   : > { %v833_v62 = vpop.eup %832 }
 0x1c6   : > { %594 = vst [vmem:[%s164_s25 + $0x18] sm:$0xff] %v833_v62  ;;  %v835_v0 = vpop.eup %834 }
 0x1c7   : > { %v837_v46 = vpop.eup %836  ;;  %593 = vst [vmem:[%s164_s25 + $0x10] sm:$0xff] %v835_v0 }
 0x1c8   : > { %596 = vst [vmem:[%s164_s25 + $0x28] sm:$0xff] %v837_v46  ;;  %v839_v1 = vpop.eup %838 }
 0x1c9   : > { %595 = vst [vmem:[%s164_s25 + $0x20] sm:$0xff] %v839_v1 }
 0x1cb   : > { %v841_v2 = vpop.eup %840 }
 0x1cc   : > { %598 = vst [vmem:[%s164_s25 + $0x38] sm:$0xff] %v841_v2  ;;  %v843_v4 = vpop.eup %842 }
 0x1cd   : > { %597 = vst [vmem:[%s164_s25 + $0x30] sm:$0xff] %v843_v4 }
 0x1ce   : > { %857 = shalt.err (!%p854_p3)
}
 0x1cf   : > { %s858_s8 = scalar_lea.hbm %s1163_s30, 1024  ;;  %s862_s11 = scalar_lea.hbm %s1213_s3, 4096 }
 0x1d0   : > { %p859_p4 = scmp.ne.s32.totalorder %s1163_s30, %s858_s8  ;;  %p863_p9 = scmp.lt.u32.totalorder %s1163_s30, %s1213_s3 }
 0x1d1   : > { %p864_p10 = scmp.lt.u32.totalorder %s862_s11, %s858_s8  ;;  %p866_p12 = scmp.lt.u32.totalorder %s858_s8, %s1163_s30 }
 0x1d2   : > { %p860_p7 = pnand %p859_p4, %p969_p5 }
 0x1d3   : > { %p865_p11 = por %p864_p10, %p863_p9 }
 0x1d4   : > { %p861_p8 = pneg %p860_p7 }
 0x1d5   : > { %p867_p13 = por %p866_p12, %p865_p11 }
 0x1d7   : > { %p868_p0 = pnand %p867_p13, %p861_p8 }
 0x1d9   : > { %871 = shalt.err (!%p868_p0)
}
 0x1da   : > { %s909_s20 = smov 128   ;;  %s910_s24 = smov 8  }
 0x1db   : > { %755 = dma.vmem_to_hbm [thread:$0]  (%p969_p5), %s1165_s27, 1024, %s1163_s30, %s1169_s4, %s909_s20, %s909_s20, %s910_s24  }
 0x1dc PF: > { %p761_p1 = scmp.ge.s32.totalorder %s906_s15, 2  ;;  %s628_s25 = sand.u32 1, %s894_s12  }
 0x1dd   : > { %s629_s26 = scalar_lea.sflag [#allocation3], %s628_s25 }
 0x1de   : > { %p758_p2 = pnand %p761_p1, %p973_p6 }
 0x1e0   : > { %889 = dma.done.wait (!%p758_p2), %s629_s26, 1024  }
 0x1e1   : > { %891 = vsyncadd (!%p758_p2), %s629_s26, 4294966272  ;;  %p13_p3 = scmp.ge.s32.totalorder %s956_s18, 6   ;;  %s1216_s12 = smov %s898_s13 }
 0x1e2   : > { %s1217_s13 = smov %s902_s14  ;;  %s1218_s14 = smov %s967_s21 }
 0x1e3   : > { %s1219_s15 = smov %s956_s18  ;;  %15 = sbr.rel (!%p13_p3) target bundleno = 3 (0x3), region = 67 }
 0x1ea   :  { %634 = vsyncpa [#allocation3], 1 }
 0x1eb   :  { %636 = vsyncpa [#allocation3 + $0x1], 1 }

</bundles_post_ra>
